<compile_context>
chip_gen: v5e
topology: v5e:2x2
jax: 0.10.0
libtpu: 0.0.40
codegen_flags: <defaults>
</compile_context>

<pallas_src>
import math

import jax
import jax.numpy as jnp
import numpy as np
from jax.experimental import pallas as pl
from jax.experimental.pallas import tpu as pltpu

# ---- model hyper-params (small, consistent with the module) ----
B, S, D = 2, 8, 64
N_HEADS, N_KV_HEADS = 4, 2
HEAD_DIM = D // N_HEADS                       # 16
N_REP = N_HEADS // N_KV_HEADS                 # 2
Q_DIM = N_HEADS * HEAD_DIM                    # 64
KV_DIM = N_KV_HEADS * HEAD_DIM                # 32
QKV_DIM = Q_DIM + 2 * KV_DIM                  # 128 (lane-dense fused proj)
BS = B * S                                    # 16 flattened rows
_hd = int(2 * (4 * D) / 3)                    # FeedForwardRef hidden sizing
MULTIPLE_OF = 256
HIDDEN = MULTIPLE_OF * ((_hd + MULTIPLE_OF - 1) // MULTIPLE_OF)  # 256
EPS = 1e-5
ROPE_THETA = 10000.0


def _block_kernel(x_ref, mask_ref, cossin_ref, wqkv_ref, wo_ref, w13_ref,
                  w2_ref, out_ref):
    x = x_ref[...]                                            # (BS, D) f32

    # ---- attention RMSNorm (gain folded into wqkv rows host-side) ----
    xn = x * jax.lax.rsqrt(jnp.mean(x * x, axis=-1, keepdims=True) + EPS)

    # ---- fused q|k|v projection with RoPE pair-swap folded in: one
    #      lane-dense N=256 bf16 MXU pass ----
    qkv_ext = jnp.dot(xn.astype(jnp.bfloat16), wqkv_ref[...],
                      preferred_element_type=jnp.float32)     # (BS, 256)

    cos = cossin_ref[:, :QKV_DIM]
    sin = cossin_ref[:, QKV_DIM:]
    # interleaved RoPE for q and k; V columns pass through (cos=1, rot-half=0)
    qkv = qkv_ext[:, :QKV_DIM] * cos + qkv_ext[:, QKV_DIM:] * sin  # (BS, 128)

    q = qkv[:, :Q_DIM].astype(jnp.bfloat16)                   # already scaled by 1/sqrt(hd)
    k = qkv[:, Q_DIM:Q_DIM + KV_DIM].astype(jnp.bfloat16)
    v = qkv[:, Q_DIM + KV_DIM:].astype(jnp.bfloat16)

    mask2 = mask_ref[...]                                     # (N_REP*BS, BS) block-diag causal
    wo = wo_ref[...]                                          # (D, D) bf16

    attn = jnp.zeros((BS, D), jnp.float32)
    for g in range(N_KV_HEADS):                               # per-KV-group (GQA)
        kh = k[:, g * HEAD_DIM:(g + 1) * HEAD_DIM]            # (BS, hd)
        vh = v[:, g * HEAD_DIM:(g + 1) * HEAD_DIM]
        h0 = g * N_REP
        # stack the group's query heads along rows -> fatter MXU push
        qg = jnp.concatenate(
            [q[:, (h0 + r) * HEAD_DIM:(h0 + r + 1) * HEAD_DIM]
             for r in range(N_REP)], axis=0)                  # (N_REP*BS, hd)
        # contract last dims (trans_b) -> no explicit K transpose
        s = jax.lax.dot_general(qg, kh, (((1,), (1,)), ((), ())),
                                preferred_element_type=jnp.float32) + mask2
        m = jnp.max(s, axis=-1, keepdims=True)
        p = jnp.exp(s - m)
        denom = jnp.sum(p, axis=-1, keepdims=True)
        ctx = jnp.dot(p.astype(jnp.bfloat16), vh,
                      preferred_element_type=jnp.float32)     # (N_REP*BS, hd)
        ctx = (ctx * pl.reciprocal(denom, approx=True)).astype(jnp.bfloat16)
        # per-head wo accumulation: lane-dense N=64, no lane concat / relayout
        for r in range(N_REP):
            h = h0 + r
            attn = attn + jnp.dot(
                ctx[r * BS:(r + 1) * BS, :],
                wo[h * HEAD_DIM:(h + 1) * HEAD_DIM, :],
                preferred_element_type=jnp.float32)

    h_res = x + attn

    # ---- ffn RMSNorm (gain folded into w13 rows) + SwiGLU MLP ----
    hn = h_res * jax.lax.rsqrt(jnp.mean(h_res * h_res, axis=-1,
                                        keepdims=True) + EPS)
    ab = jnp.dot(hn.astype(jnp.bfloat16), w13_ref[...],
                 preferred_element_type=jnp.float32)          # (BS, 2*HIDDEN)
    a = ab[:, :HIDDEN]                                        # lane-aligned split at 256
    b3 = ab[:, HIDDEN:]
    g13 = (a * jax.nn.sigmoid(a) * b3).astype(jnp.bfloat16)
    mlp = jnp.dot(g13, w2_ref[...], preferred_element_type=jnp.float32)
    out_ref[...] = h_res + mlp


def transformer_block(x, mask2, cossin, wqkv_ext, wo_b, w13_b, w2_b):
    b, s, d = x.shape
    x_flat = x.reshape(b * s, d)

    def full_spec(arr):
        nd = arr.ndim
        return pl.BlockSpec(arr.shape, lambda i, nd=nd: (0,) * nd)

    args = (x_flat, mask2, cossin, wqkv_ext, wo_b, w13_b, w2_b)
    out_flat = pl.pallas_call(
        _block_kernel,
        out_shape=jax.ShapeDtypeStruct((b * s, d), jnp.float32),
        grid_spec=pltpu.PrefetchScalarGridSpec(
            num_scalar_prefetch=0,
            grid=(1,),                                        # single step: whole block
            in_specs=[full_spec(a) for a in args],
            out_specs=full_spec(x_flat),
        ),
        compiler_params=pltpu.CompilerParams(
            dimension_semantics=("arbitrary",)),
    )(*args)
    return out_flat.reshape(b, s, d)


# ---------------- pure-JAX reference (mirrors the PyTorch module) -------------
def _reference(x, mask, cos, sin, wq_t, wk_t, wv_t, wo_t, w1_t, w2_t, w3_t,
               anw, fnw):
    def rmsnorm(v, w):
        return v * jax.lax.rsqrt(jnp.mean(v * v, axis=-1, keepdims=True) + EPS) * w

    xn = rmsnorm(x, anw[0])
    q = (xn @ wq_t).reshape(B, S, N_HEADS, HEAD_DIM)
    k = (xn @ wk_t).reshape(B, S, N_KV_HEADS, HEAD_DIM)
    v = (xn @ wv_t).reshape(B, S, N_KV_HEADS, HEAD_DIM)

    def rope(t):
        tr = t.reshape(*t.shape[:-1], HEAD_DIM // 2, 2)
        t0, t1 = tr[..., 0], tr[..., 1]
        c = cos[None, :, None, :]
        s = sin[None, :, None, :]
        return jnp.stack([t0 * c - t1 * s, t0 * s + t1 * c], axis=-1).reshape(t.shape)

    q, k = rope(q), rope(k)
    k = jnp.repeat(k, N_REP, axis=2)
    v = jnp.repeat(v, N_REP, axis=2)
    q, k, v = (t.transpose(0, 2, 1, 3) for t in (q, k, v))
    scores = jnp.einsum("bhqd,bhkd->bhqk", q, k) / math.sqrt(HEAD_DIM)
    scores = scores + mask[None, None]
    p = jax.nn.softmax(scores, axis=-1)
    ctx = jnp.einsum("bhqk,bhkd->bhqd", p, v).transpose(0, 2, 1, 3).reshape(B, S, D)
    h = x + ctx @ wo_t
    hn = rmsnorm(h, fnw[0])
    mlp = (jax.nn.silu(hn @ w1_t) * (hn @ w3_t)) @ w2_t
    return h + mlp


if __name__ == "__main__":
    key = jax.random.PRNGKey(0)
    keys = jax.random.split(key, 10)

    def init(k, shape, scale=0.02):
        return scale * jax.random.normal(k, shape, jnp.float32)

    x = jax.random.normal(keys[0], (B, S, D), jnp.float32)
    wq_t = init(keys[1], (D, Q_DIM))
    wk_t = init(keys[2], (D, KV_DIM))
    wv_t = init(keys[3], (D, KV_DIM))
    wo_t = init(keys[4], (Q_DIM, D))
    w1_t = init(keys[5], (D, HIDDEN))
    w2_t = init(keys[6], (HIDDEN, D))
    w3_t = init(keys[7], (D, HIDDEN))
    # RMSNorm weights (module inits to ones; perturbed deterministically)
    anw = jnp.ones((1, D), jnp.float32) + 0.1 * jax.random.normal(keys[8], (1, D))
    fnw = jnp.ones((1, D), jnp.float32) + 0.1 * jax.random.normal(keys[9], (1, D))

    # ---- host-side weight fusion / folding ----
    # RoPE pair-swap matrix: (x @ P)[2i] = -x[2i+1], (x @ P)[2i+1] = x[2i]
    Pp = np.zeros((HEAD_DIM, HEAD_DIM), np.float32)
    for i in range(HEAD_DIM // 2):
        Pp[2 * i + 1, 2 * i] = -1.0
        Pp[2 * i, 2 * i + 1] = 1.0
    p_q = np.kron(np.eye(N_HEADS, dtype=np.float32), Pp)      # (64, 64)
    p_k = np.kron(np.eye(N_KV_HEADS, dtype=np.float32), Pp)   # (32, 32)
    p_full_np = np.zeros((QKV_DIM, QKV_DIM), np.float32)      # (128, 128)
    p_full_np[:Q_DIM, :Q_DIM] = p_q
    p_full_np[Q_DIM:Q_DIM + KV_DIM, Q_DIM:Q_DIM + KV_DIM] = p_k  # V block = 0

    score_scale = 1.0 / math.sqrt(HEAD_DIM)
    wqkv = jnp.concatenate([wq_t * score_scale, wk_t, wv_t], axis=1)   # (D, 128)
    wqkv_rot = wqkv @ jnp.asarray(p_full_np)                            # (D, 128)
    wqkv_ext = jnp.concatenate([wqkv, wqkv_rot], axis=1)                # (D, 256)
    wqkv_ext = (anw[0][:, None] * wqkv_ext).astype(jnp.bfloat16)        # fold attn-norm gain

    w13 = jnp.concatenate([w1_t, w3_t], axis=1)                         # (D, 512)
    w13_b = (fnw[0][:, None] * w13).astype(jnp.bfloat16)                # fold ffn-norm gain
    wo_b = wo_t.astype(jnp.bfloat16)
    w2_b = w2_t.astype(jnp.bfloat16)

    # ---- rotary tables (real cos/sin equivalent of complex freqs_cis) ----
    inv_freq = 1.0 / (ROPE_THETA ** (np.arange(0, HEAD_DIM, 2, dtype=np.float32)
                                     / HEAD_DIM))
    ang = np.outer(np.arange(S, dtype=np.float32), inv_freq)  # (S, hd/2)
    cos_np = np.cos(ang).astype(np.float32)
    sin_np = np.sin(ang).astype(np.float32)
    cos_dup = np.repeat(cos_np, 2, axis=-1)                   # interleaved dup (S, hd)
    sin_dup = np.repeat(sin_np, 2, axis=-1)
    # fused tables over [q | k | v] columns; V columns pass through (cos=1, sin=0)
    cos_row = np.concatenate([np.tile(cos_dup, (1, N_HEADS)),
                              np.tile(cos_dup, (1, N_KV_HEADS)),
                              np.ones((S, KV_DIM), np.float32)], axis=1)   # (S, 128)
    sin_row = np.concatenate([np.tile(sin_dup, (1, N_HEADS)),
                              np.tile(sin_dup, (1, N_KV_HEADS)),
                              np.zeros((S, KV_DIM), np.float32)], axis=1)
    cossin = jnp.asarray(np.concatenate([np.tile(cos_row, (B, 1)),
                                         np.tile(sin_row, (B, 1))], axis=1))  # (B*S, 256)

    # causal mask with -inf above the diagonal (llama2 reference convention)
    row = np.arange(S)[:, None]
    col = np.arange(S)[None, :]
    causal = np.where(col <= row, 0.0, -np.inf).astype(np.float32)        # (S, S)
    # block-diagonal version for the flattened (B*S, B*S) attention
    mask_flat_np = np.full((BS, BS), -np.inf, dtype=np.float32)
    for bi in range(B):
        mask_flat_np[bi * S:(bi + 1) * S, bi * S:(bi + 1) * S] = causal
    # pre-tiled for the N_REP row-stacked query heads of each KV group
    mask2 = jnp.asarray(np.tile(mask_flat_np, (N_REP, 1)))                # (32, 16)

    out = transformer_block(x, mask2, cossin, wqkv_ext, wo_b, w13_b, w2_b)
    out = jax.block_until_ready(out)

    ref = _reference(x, jnp.asarray(causal), jnp.asarray(cos_np), jnp.asarray(sin_np),
                     wq_t, wk_t, wv_t, wo_t, w1_t, w2_t, w3_t, anw, fnw)
    # tolerance relaxed for bf16 MXU operands + approx-reciprocal softmax
    np.testing.assert_allclose(np.asarray(out), np.asarray(ref),
                               rtol=2e-2, atol=2e-2)
    print("KERNEL_OK")
</pallas_src>

<mosaic_0001>
module attributes {stable_mosaic.version = 11 : i64} {
  func.func @_block_kernel(%arg0: i32, %arg1: memref<16x64xf32, #tpu.memory_space<vmem>>, %arg2: memref<32x16xf32, #tpu.memory_space<vmem>>, %arg3: memref<16x256xf32, #tpu.memory_space<vmem>>, %arg4: memref<64x256xbf16, #tpu.memory_space<vmem>>, %arg5: memref<64x64xbf16, #tpu.memory_space<vmem>>, %arg6: memref<64x512xbf16, #tpu.memory_space<vmem>>, %arg7: memref<256x64xbf16, #tpu.memory_space<vmem>>, %arg8: memref<16x64xf32, #tpu.memory_space<vmem>>) attributes {dimension_semantics = [#tpu.dimension_semantics<arbitrary>], iteration_bounds = array<i64: 1>, scalar_prefetch = 0 : i64, scratch_operands = 0 : i64, tpu.core_type = #tpu.core_type<tc>, window_params = [{pipeline_mode = #tpu.pipeline_mode<synchronous>, transform_indices = @transform_0, window_bounds = array<i64: 16, 64>}, {pipeline_mode = #tpu.pipeline_mode<synchronous>, transform_indices = @transform_1, window_bounds = array<i64: 32, 16>}, {pipeline_mode = #tpu.pipeline_mode<synchronous>, transform_indices = @transform_2, window_bounds = array<i64: 16, 256>}, {pipeline_mode = #tpu.pipeline_mode<synchronous>, transform_indices = @transform_3, window_bounds = array<i64: 64, 256>}, {pipeline_mode = #tpu.pipeline_mode<synchronous>, transform_indices = @transform_4, window_bounds = array<i64: 64, 64>}, {pipeline_mode = #tpu.pipeline_mode<synchronous>, transform_indices = @transform_5, window_bounds = array<i64: 64, 512>}, {pipeline_mode = #tpu.pipeline_mode<synchronous>, transform_indices = @transform_6, window_bounds = array<i64: 256, 64>}, {pipeline_mode = #tpu.pipeline_mode<synchronous>, transform_indices = @transform_7, window_bounds = array<i64: 16, 64>}]} {
    %c0 = arith.constant 0 : index
    %c0_0 = arith.constant 0 : index
    %0 = vector.load %arg1[%c0, %c0_0] : memref<16x64xf32, #tpu.memory_space<vmem>>, vector<16x64xf32>
    %1 = arith.mulf %0, %0 : vector<16x64xf32>
    %cst = arith.constant dense<0.000000e+00> : vector<16xf32>
    %2 = vector.multi_reduction <add>, %1, %cst [1] : vector<16x64xf32> to vector<16xf32>
    %3 = vector.shape_cast %2 : vector<16xf32> to vector<16x1xf32>
    %cst_1 = arith.constant 6.400000e+01 : f32
    %4 = vector.broadcast %cst_1 : f32 to vector<16x1xf32>
    %5 = arith.divf %3, %4 : vector<16x1xf32>
    %cst_2 = arith.constant 9.99999974E-6 : f32
    %6 = vector.broadcast %cst_2 : f32 to vector<16x1xf32>
    %7 = arith.addf %5, %6 : vector<16x1xf32>
    %8 = math.rsqrt %7 : vector<16x1xf32>
    %9 = vector.broadcast %8 : vector<16x1xf32> to vector<16x64xf32>
    %10 = arith.mulf %0, %9 : vector<16x64xf32>
    %11 = arith.truncf %10 : vector<16x64xf32> to vector<16x64xbf16>
    %c0_3 = arith.constant 0 : index
    %c0_4 = arith.constant 0 : index
    %12 = vector.load %arg4[%c0_3, %c0_4] : memref<64x256xbf16, #tpu.memory_space<vmem>>, vector<64x256xbf16>
    %cst_5 = arith.constant dense<0.000000e+00> : vector<16x256xf32>
    %13 = tpu.matmul %11, %12, %cst_5 {dimension_numbers = #tpu.dot_dimension_numbers<[1], [0], [0], [1], [0, 0, 1, 1], [], []>} : vector<16x64xbf16>, vector<64x256xbf16>, vector<16x256xf32> -> vector<16x256xf32>
    %c0_6 = arith.constant 0 : index
    %c0_7 = arith.constant 0 : index
    %14 = vector.load %arg3[%c0_6, %c0_7] : memref<16x256xf32, #tpu.memory_space<vmem>>, vector<16x128xf32>
    %c0_8 = arith.constant 0 : index
    %c128 = arith.constant 128 : index
    %15 = vector.load %arg3[%c0_8, %c128] : memref<16x256xf32, #tpu.memory_space<vmem>>, vector<16x128xf32>
    %16 = vector.extract_strided_slice %13 {offsets = [0, 0], sizes = [16, 128], strides = [1, 1]} : vector<16x256xf32> to vector<16x128xf32>
    %17 = arith.mulf %16, %14 : vector<16x128xf32>
    %18 = vector.extract_strided_slice %13 {offsets = [0, 128], sizes = [16, 128], strides = [1, 1]} : vector<16x256xf32> to vector<16x128xf32>
    %19 = arith.mulf %18, %15 : vector<16x128xf32>
    %20 = arith.addf %17, %19 : vector<16x128xf32>
    %21 = vector.extract_strided_slice %20 {offsets = [0, 0], sizes = [16, 64], strides = [1, 1]} : vector<16x128xf32> to vector<16x64xf32>
    %22 = arith.truncf %21 : vector<16x64xf32> to vector<16x64xbf16>
    %23 = vector.extract_strided_slice %20 {offsets = [0, 64], sizes = [16, 32], strides = [1, 1]} : vector<16x128xf32> to vector<16x32xf32>
    %24 = arith.truncf %23 : vector<16x32xf32> to vector<16x32xbf16>
    %25 = vector.extract_strided_slice %20 {offsets = [0, 96], sizes = [16, 32], strides = [1, 1]} : vector<16x128xf32> to vector<16x32xf32>
    %26 = arith.truncf %25 : vector<16x32xf32> to vector<16x32xbf16>
    %c0_9 = arith.constant 0 : index
    %c0_10 = arith.constant 0 : index
    %27 = vector.load %arg2[%c0_9, %c0_10] : memref<32x16xf32, #tpu.memory_space<vmem>>, vector<32x16xf32>
    %c0_11 = arith.constant 0 : index
    %c0_12 = arith.constant 0 : index
    %28 = vector.load %arg5[%c0_11, %c0_12] : memref<64x64xbf16, #tpu.memory_space<vmem>>, vector<64x64xbf16>
    %cst_13 = arith.constant 0.000000e+00 : f32
    %29 = vector.broadcast %cst_13 : f32 to vector<16x64xf32>
    %30 = vector.extract_strided_slice %24 {offsets = [0, 0], sizes = [16, 16], strides = [1, 1]} : vector<16x32xbf16> to vector<16x16xbf16>
    %31 = vector.extract_strided_slice %26 {offsets = [0, 0], sizes = [16, 16], strides = [1, 1]} : vector<16x32xbf16> to vector<16x16xbf16>
    %32 = vector.extract_strided_slice %22 {offsets = [0, 0], sizes = [16, 16], strides = [1, 1]} : vector<16x64xbf16> to vector<16x16xbf16>
    %33 = vector.extract_strided_slice %22 {offsets = [0, 16], sizes = [16, 16], strides = [1, 1]} : vector<16x64xbf16> to vector<16x16xbf16>
    %34 = tpu.concatenate %32, %33 in 0 : vector<16x16xbf16>, vector<16x16xbf16> -> vector<32x16xbf16>
    %cst_14 = arith.constant dense<0.000000e+00> : vector<32x16xf32>
    %35 = tpu.matmul %34, %30, %cst_14 {dimension_numbers = #tpu.dot_dimension_numbers<[1], [1], [0], [0], [0, 0, 1, 0], [], []>} : vector<32x16xbf16>, vector<16x16xbf16>, vector<32x16xf32> -> vector<32x16xf32>
    %36 = arith.addf %35, %27 : vector<32x16xf32>
    %cst_15 = arith.constant dense<0xFF800000> : vector<32xf32>
    %37 = vector.multi_reduction <maximumf>, %36, %cst_15 [1] : vector<32x16xf32> to vector<32xf32>
    %38 = vector.shape_cast %37 : vector<32xf32> to vector<32x1xf32>
    %39 = vector.broadcast %38 : vector<32x1xf32> to vector<32x16xf32>
    %40 = arith.subf %36, %39 : vector<32x16xf32>
    %41 = math.exp %40 : vector<32x16xf32>
    %cst_16 = arith.constant dense<0.000000e+00> : vector<32xf32>
    %42 = vector.multi_reduction <add>, %41, %cst_16 [1] : vector<32x16xf32> to vector<32xf32>
    %43 = vector.shape_cast %42 : vector<32xf32> to vector<32x1xf32>
    %44 = arith.truncf %41 : vector<32x16xf32> to vector<32x16xbf16>
    %cst_17 = arith.constant dense<0.000000e+00> : vector<32x16xf32>
    %45 = tpu.matmul %44, %31, %cst_17 {dimension_numbers = #tpu.dot_dimension_numbers<[1], [0], [0], [1], [0, 0, 1, 1], [], []>} : vector<32x16xbf16>, vector<16x16xbf16>, vector<32x16xf32> -> vector<32x16xf32>
    %46 = tpu.reciprocal %43 {approx = true} : vector<32x1xf32> -> vector<32x1xf32>
    %47 = vector.broadcast %46 : vector<32x1xf32> to vector<32x16xf32>
    %48 = arith.mulf %45, %47 : vector<32x16xf32>
    %49 = arith.truncf %48 : vector<32x16xf32> to vector<32x16xbf16>
    %50 = vector.extract_strided_slice %49 {offsets = [0, 0], sizes = [16, 16], strides = [1, 1]} : vector<32x16xbf16> to vector<16x16xbf16>
    %51 = vector.extract_strided_slice %28 {offsets = [0, 0], sizes = [16, 64], strides = [1, 1]} : vector<64x64xbf16> to vector<16x64xbf16>
    %cst_18 = arith.constant dense<0.000000e+00> : vector<16x64xf32>
    %52 = tpu.matmul %50, %51, %cst_18 {dimension_numbers = #tpu.dot_dimension_numbers<[1], [0], [0], [1], [0, 0, 1, 1], [], []>} : vector<16x16xbf16>, vector<16x64xbf16>, vector<16x64xf32> -> vector<16x64xf32>
    %53 = arith.addf %29, %52 : vector<16x64xf32>
    %54 = vector.extract_strided_slice %49 {offsets = [16, 0], sizes = [16, 16], strides = [1, 1]} : vector<32x16xbf16> to vector<16x16xbf16>
    %55 = vector.extract_strided_slice %28 {offsets = [16, 0], sizes = [16, 64], strides = [1, 1]} : vector<64x64xbf16> to vector<16x64xbf16>
    %cst_19 = arith.constant dense<0.000000e+00> : vector<16x64xf32>
    %56 = tpu.matmul %54, %55, %cst_19 {dimension_numbers = #tpu.dot_dimension_numbers<[1], [0], [0], [1], [0, 0, 1, 1], [], []>} : vector<16x16xbf16>, vector<16x64xbf16>, vector<16x64xf32> -> vector<16x64xf32>
    %57 = arith.addf %53, %56 : vector<16x64xf32>
    %58 = vector.extract_strided_slice %24 {offsets = [0, 16], sizes = [16, 16], strides = [1, 1]} : vector<16x32xbf16> to vector<16x16xbf16>
    %59 = vector.extract_strided_slice %26 {offsets = [0, 16], sizes = [16, 16], strides = [1, 1]} : vector<16x32xbf16> to vector<16x16xbf16>
    %60 = vector.extract_strided_slice %22 {offsets = [0, 32], sizes = [16, 16], strides = [1, 1]} : vector<16x64xbf16> to vector<16x16xbf16>
    %61 = vector.extract_strided_slice %22 {offsets = [0, 48], sizes = [16, 16], strides = [1, 1]} : vector<16x64xbf16> to vector<16x16xbf16>
    %62 = tpu.concatenate %60, %61 in 0 : vector<16x16xbf16>, vector<16x16xbf16> -> vector<32x16xbf16>
    %cst_20 = arith.constant dense<0.000000e+00> : vector<32x16xf32>
    %63 = tpu.matmul %62, %58, %cst_20 {dimension_numbers = #tpu.dot_dimension_numbers<[1], [1], [0], [0], [0, 0, 1, 0], [], []>} : vector<32x16xbf16>, vector<16x16xbf16>, vector<32x16xf32> -> vector<32x16xf32>
    %64 = arith.addf %63, %27 : vector<32x16xf32>
    %cst_21 = arith.constant dense<0xFF800000> : vector<32xf32>
    %65 = vector.multi_reduction <maximumf>, %64, %cst_21 [1] : vector<32x16xf32> to vector<32xf32>
    %66 = vector.shape_cast %65 : vector<32xf32> to vector<32x1xf32>
    %67 = vector.broadcast %66 : vector<32x1xf32> to vector<32x16xf32>
    %68 = arith.subf %64, %67 : vector<32x16xf32>
    %69 = math.exp %68 : vector<32x16xf32>
    %cst_22 = arith.constant dense<0.000000e+00> : vector<32xf32>
    %70 = vector.multi_reduction <add>, %69, %cst_22 [1] : vector<32x16xf32> to vector<32xf32>
    %71 = vector.shape_cast %70 : vector<32xf32> to vector<32x1xf32>
    %72 = arith.truncf %69 : vector<32x16xf32> to vector<32x16xbf16>
    %cst_23 = arith.constant dense<0.000000e+00> : vector<32x16xf32>
    %73 = tpu.matmul %72, %59, %cst_23 {dimension_numbers = #tpu.dot_dimension_numbers<[1], [0], [0], [1], [0, 0, 1, 1], [], []>} : vector<32x16xbf16>, vector<16x16xbf16>, vector<32x16xf32> -> vector<32x16xf32>
    %74 = tpu.reciprocal %71 {approx = true} : vector<32x1xf32> -> vector<32x1xf32>
    %75 = vector.broadcast %74 : vector<32x1xf32> to vector<32x16xf32>
    %76 = arith.mulf %73, %75 : vector<32x16xf32>
    %77 = arith.truncf %76 : vector<32x16xf32> to vector<32x16xbf16>
    %78 = vector.extract_strided_slice %77 {offsets = [0, 0], sizes = [16, 16], strides = [1, 1]} : vector<32x16xbf16> to vector<16x16xbf16>
    %79 = vector.extract_strided_slice %28 {offsets = [32, 0], sizes = [16, 64], strides = [1, 1]} : vector<64x64xbf16> to vector<16x64xbf16>
    %cst_24 = arith.constant dense<0.000000e+00> : vector<16x64xf32>
    %80 = tpu.matmul %78, %79, %cst_24 {dimension_numbers = #tpu.dot_dimension_numbers<[1], [0], [0], [1], [0, 0, 1, 1], [], []>} : vector<16x16xbf16>, vector<16x64xbf16>, vector<16x64xf32> -> vector<16x64xf32>
    %81 = arith.addf %57, %80 : vector<16x64xf32>
    %82 = vector.extract_strided_slice %77 {offsets = [16, 0], sizes = [16, 16], strides = [1, 1]} : vector<32x16xbf16> to vector<16x16xbf16>
    %83 = vector.extract_strided_slice %28 {offsets = [48, 0], sizes = [16, 64], strides = [1, 1]} : vector<64x64xbf16> to vector<16x64xbf16>
    %cst_25 = arith.constant dense<0.000000e+00> : vector<16x64xf32>
    %84 = tpu.matmul %82, %83, %cst_25 {dimension_numbers = #tpu.dot_dimension_numbers<[1], [0], [0], [1], [0, 0, 1, 1], [], []>} : vector<16x16xbf16>, vector<16x64xbf16>, vector<16x64xf32> -> vector<16x64xf32>
    %85 = arith.addf %81, %84 : vector<16x64xf32>
    %86 = arith.addf %0, %85 : vector<16x64xf32>
    %87 = arith.mulf %86, %86 : vector<16x64xf32>
    %cst_26 = arith.constant dense<0.000000e+00> : vector<16xf32>
    %88 = vector.multi_reduction <add>, %87, %cst_26 [1] : vector<16x64xf32> to vector<16xf32>
    %89 = vector.shape_cast %88 : vector<16xf32> to vector<16x1xf32>
    %cst_27 = arith.constant 6.400000e+01 : f32
    %90 = vector.broadcast %cst_27 : f32 to vector<16x1xf32>
    %91 = arith.divf %89, %90 : vector<16x1xf32>
    %cst_28 = arith.constant 9.99999974E-6 : f32
    %92 = vector.broadcast %cst_28 : f32 to vector<16x1xf32>
    %93 = arith.addf %91, %92 : vector<16x1xf32>
    %94 = math.rsqrt %93 : vector<16x1xf32>
    %95 = vector.broadcast %94 : vector<16x1xf32> to vector<16x64xf32>
    %96 = arith.mulf %86, %95 : vector<16x64xf32>
    %97 = arith.truncf %96 : vector<16x64xf32> to vector<16x64xbf16>
    %c0_29 = arith.constant 0 : index
    %c0_30 = arith.constant 0 : index
    %98 = vector.load %arg6[%c0_29, %c0_30] : memref<64x512xbf16, #tpu.memory_space<vmem>>, vector<64x512xbf16>
    %cst_31 = arith.constant dense<0.000000e+00> : vector<16x512xf32>
    %99 = tpu.matmul %97, %98, %cst_31 {dimension_numbers = #tpu.dot_dimension_numbers<[1], [0], [0], [1], [0, 0, 1, 1], [], []>} : vector<16x64xbf16>, vector<64x512xbf16>, vector<16x512xf32> -> vector<16x512xf32>
    %100 = vector.extract_strided_slice %99 {offsets = [0, 0], sizes = [16, 256], strides = [1, 1]} : vector<16x512xf32> to vector<16x256xf32>
    %101 = vector.extract_strided_slice %99 {offsets = [0, 256], sizes = [16, 256], strides = [1, 1]} : vector<16x512xf32> to vector<16x256xf32>
    %102 = arith.negf %100 : vector<16x256xf32>
    %103 = math.exp %102 : vector<16x256xf32>
    %cst_32 = arith.constant 1.000000e+00 : f32
    %104 = vector.broadcast %cst_32 : f32 to vector<16x256xf32>
    %105 = arith.addf %104, %103 : vector<16x256xf32>
    %106 = arith.divf %104, %105 : vector<16x256xf32>
    %107 = arith.mulf %100, %106 : vector<16x256xf32>
    %108 = arith.mulf %107, %101 : vector<16x256xf32>
    %109 = arith.truncf %108 : vector<16x256xf32> to vector<16x256xbf16>
    %c0_33 = arith.constant 0 : index
    %c0_34 = arith.constant 0 : index
    %110 = vector.load %arg7[%c0_33, %c0_34] : memref<256x64xbf16, #tpu.memory_space<vmem>>, vector<256x64xbf16>
    %cst_35 = arith.constant dense<0.000000e+00> : vector<16x64xf32>
    %111 = tpu.matmul %109, %110, %cst_35 {dimension_numbers = #tpu.dot_dimension_numbers<[1], [0], [0], [1], [0, 0, 1, 1], [], []>} : vector<16x256xbf16>, vector<256x64xbf16>, vector<16x64xf32> -> vector<16x64xf32>
    %112 = arith.addf %86, %111 : vector<16x64xf32>
    %c0_36 = arith.constant 0 : index
    %c0_37 = arith.constant 0 : index
    %113 = vector.load %arg8[%c0_36, %c0_37] : memref<16x64xf32, #tpu.memory_space<vmem>>, vector<16x64xf32>
    tpu.vector_store %arg8[%c0_36, %c0_37], %112 {strides = array<i32>} : memref<16x64xf32, #tpu.memory_space<vmem>>, vector<16x64xf32>,
    return
  }
  func.func @transform_0(%arg0: i32) -> (i32, i32) {
    %c0_i32 = arith.constant 0 : i32
    %c0_i32_0 = arith.constant 0 : i32
    %c0_i32_1 = arith.constant 0 : i32
    return %c0_i32, %c0_i32_0 : i32, i32
  }
  func.func @transform_1(%arg0: i32) -> (i32, i32) {
    %c0_i32 = arith.constant 0 : i32
    %c0_i32_0 = arith.constant 0 : i32
    %c0_i32_1 = arith.constant 0 : i32
    return %c0_i32, %c0_i32_0 : i32, i32
  }
  func.func @transform_2(%arg0: i32) -> (i32, i32) {
    %c0_i32 = arith.constant 0 : i32
    %c0_i32_0 = arith.constant 0 : i32
    %c0_i32_1 = arith.constant 0 : i32
    return %c0_i32, %c0_i32_0 : i32, i32
  }
  func.func @transform_3(%arg0: i32) -> (i32, i32) {
    %c0_i32 = arith.constant 0 : i32
    %c0_i32_0 = arith.constant 0 : i32
    %c0_i32_1 = arith.constant 0 : i32
    return %c0_i32, %c0_i32_0 : i32, i32
  }
  func.func @transform_4(%arg0: i32) -> (i32, i32) {
    %c0_i32 = arith.constant 0 : i32
    %c0_i32_0 = arith.constant 0 : i32
    %c0_i32_1 = arith.constant 0 : i32
    return %c0_i32, %c0_i32_0 : i32, i32
  }
  func.func @transform_5(%arg0: i32) -> (i32, i32) {
    %c0_i32 = arith.constant 0 : i32
    %c0_i32_0 = arith.constant 0 : i32
    %c0_i32_1 = arith.constant 0 : i32
    return %c0_i32, %c0_i32_0 : i32, i32
  }
  func.func @transform_6(%arg0: i32) -> (i32, i32) {
    %c0_i32 = arith.constant 0 : i32
    %c0_i32_0 = arith.constant 0 : i32
    %c0_i32_1 = arith.constant 0 : i32
    return %c0_i32, %c0_i32_0 : i32, i32
  }
  func.func @transform_7(%arg0: i32) -> (i32, i32) {
    %c0_i32 = arith.constant 0 : i32
    %c0_i32_0 = arith.constant 0 : i32
    %c0_i32_1 = arith.constant 0 : i32
    return %c0_i32, %c0_i32_0 : i32, i32
  }
}

</mosaic_0001>

<bundles_post_ra>
// kernel: tpu_custom_call.1
= control target key start
LH: loop header
LB: loop body
LE: loop exit
PB: predicated region body
PF: predicated region fallthrough
CT: control target
= control target key end

     0   :  { %12 = vsyncpa [#allocation3], 0  ;;  %s1773_s0 = inlined_call_operand.vmem [shape: f32[16,64], index: 0, kind: input, shape index: {}]   ;;  %s1774_s1 = inlined_call_operand.vmem [shape: f32[32,16], index: 1, kind: input, shape index: {}]   ;;  %s1775_s2 = inlined_call_operand.vmem [shape: f32[16,256], index: 2, kind: input, shape index: {}]   ;;  %s1776_s3 = inlined_call_operand.vmem [shape: bf16[64,256], index: 3, kind: input, shape index: {}]   ;;  %s1777_s4 = inlined_call_operand.hbm [shape: bf16[64,64], index: 4, kind: input, shape index: {}]   ;;  %s1778_s5 = inlined_call_operand.vmem [shape: bf16[64,512], index: 5, kind: input, shape index: {}]   ;;  %s1779_s6 = inlined_call_operand.vmem [shape: bf16[256,64], index: 6, kind: input, shape index: {}]   ;;  %s1780_s7 = inlined_call_operand.hbm [shape: f32[16,64], index: 7, kind: output, shape index: {}]  }
   0x1   :  { %13 = vsyncpa [#allocation4], 0  ;;  %s26_s26 = sshll.u32 %s1777_s4, 4  ;;  %s1357_s27 = smov [#allocation2]   ;;  %s27_s26 = int_to_ptr.hbm [resolvable:$true] %s26_s26 }
   0x2   :  { %s28_s28 = sshll.u32 %s1357_s27, 4  ;;  %s1358_s29 = smov 64   ;;  %s29_s28 = int_to_ptr.vmem [resolvable:$true] %s28_s28 }
   0x3   :  { %s1359_s30 = smov 4  }
   0x4   :  { %34 = dma.hbm_to_vmem [thread:$0]  %s27_s26, 512, %s29_s28, [#allocation3], %s1358_s29, %s1358_s29, %s1359_s30  }
   0x5   :  { %1353 = dma.done.wait [#allocation3], 512  }
   0x6   :  { %1354 = vsyncadd [#allocation3], 4294966784  ;;  %v1417_v0 = vld [vmem:[%s1773_s0] sm:$0xff]  ;;  %vm48_vm0 = vcmask 523264   ;;  %v1424_v2 = vld [vmem:[%s1773_s0 + $0x8] sm:$0xff]  ;;  %v1360_v6 = vmov 64.0  }
   0x7   :  { %v46_v1 = vmul.f32 %v1417_v0, %v1417_v0  ;;  %v47_v4 = vmul.f32 %v1424_v2, %v1424_v2  ;;  %1247 = vrcp.f32 %v1360_v6  ;;  %v1019_v9 = vld [vmem:[%s1776_s3 + $0x30] sm:$0xf]  ;;  %v1198_v10 = vld [vmem:[%s1776_s3 + $0x34] sm:$0xf0]  ;;  %v1197_v11 = vld [vmem:[%s1776_s3 + $0x34] sm:$0xf] }
   0x8   :  { %v1020_v13 = vor.u32 %v1198_v10, %v1019_v9  ;;  %v1021_v14 = vld [vmem:[%s1776_s3 + $0x38] sm:$0xf0]  ;;  %v1011_v16 = vld [vmem:[%s1776_s3 + $0x20] sm:$0xf]  ;;  %v1196_v17 = vld [vmem:[%s1776_s3 + $0x24] sm:$0xf0] }
   0x9   :  { %v49_v3 = vsel %vm48_vm0, %v46_v1, 0.0  ;;  %v52_v5 = vsel %vm48_vm0, %v47_v4, 0.0  ;;  %v1024_v15 = vor.u32 %v1197_v11, %v1021_v14  ;;  %v1195_v18 = vld [vmem:[%s1776_s3 + $0x24] sm:$0xf]  ;;  %v1012_v20 = vor.u32 %v1196_v17, %v1011_v16  ;;  %v1013_v21 = vld [vmem:[%s1776_s3 + $0x28] sm:$0xf0] }
   0xa   :  { %50 = vadd.xlane.f32.xlu0 %v49_v3  ;;  %144 = vmatpush.bf16.msra.mxu0 %v1020_v13  ;;  %v1016_v22 = vor.u32 %v1195_v18, %v1013_v21  ;;  %v1003_v23 = vld [vmem:[%s1776_s3 + $0x10] sm:$0xf]  ;;  %v1194_v24 = vld [vmem:[%s1776_s3 + $0x14] sm:$0xf0]  ;;  %v1193_v25 = vld [vmem:[%s1776_s3 + $0x14] sm:$0xf] }
   0xb   :  { %158 = vmatpush.bf16.msra.mxu1 %v1024_v15  ;;  %v1004_v27 = vor.u32 %v1194_v24, %v1003_v23  ;;  %v1005_v28 = vld [vmem:[%s1776_s3 + $0x18] sm:$0xf0]  ;;  %v995_v30 = vld [vmem:[%s1776_s3] sm:$0xf]  ;;  %v1192_v31 = vld [vmem:[%s1776_s3 + $0x4] sm:$0xf0] }
   0xc   :  { %v1008_v29 = vor.u32 %v1193_v25, %v1005_v28  ;;  %v1191_v32 = vld [vmem:[%s1776_s3 + $0x4] sm:$0xf]  ;;  %v996_v33 = vor.u32 %v1192_v31, %v995_v30  ;;  %v997_v34 = vld [vmem:[%s1776_s3 + $0x8] sm:$0xf0]  ;;  %v169_v4 = vld [vmem:[%s1775_s2 + $0x10] sm:$0xff]  ;;  %s1361_s25 = smov 32  }
   0xd   :  { %v1248_v7 = vpop.eup %1247  ;;  %v1000_v36 = vor.u32 %v1191_v32, %v997_v34  ;;  %v168_v61 = vld [vmem:[%s1775_s2] sm:$0xff]  ;;  %v170_v63 = vld [vmem:[%s1775_s2 + $0x8] sm:$0xff]  ;;  %s1362_s26 = smov 48   ;;  %vm201_vm8 = vcmask 130048   ;;  %s1364_s27 = smov 96  }
   0xe   :  { %v56_v8 = vmul.f32 64.0, %v1248_v7  ;;  %145 = vmatpush.bf16.msra.mxu0 %v1012_v20  ;;  %vm60_vm1 = vweird.f32 %v1248_v7  ;;  %v1513_v21 = vld [vmem:[%s1774_s1] sm:$0xff]  ;;  %v1520_v25 = vld [vmem:[%s1774_s1 + $0x8] sm:$0xff]  ;;  %s980_s23 = sshll.u32 %s1780_s7, 4  ;;  %s1367_s24 = smov 128   ;;  %s981_s23 = int_to_ptr.hbm [resolvable:$true] %s980_s23 }
   0xf   :  { %159 = vmatpush.bf16.msra.mxu1 %v1016_v22 }
  0x10   :  { %v57_v12 = vsub.f32 1.0, %v56_v8 }
  0x12   :  { %53 = vadd.xlane.f32.xlu0 %v52_v5  ;;  %v58_v19 = vmul.f32 %v1248_v7, %v57_v12  ;;  %146 = vmatpush.bf16.msra.mxu0 %v1004_v27  ;;  %v171_v5 = vld [vmem:[%s1775_s2 + $0x18] sm:$0xff]  ;;  %s1363_s2 = smov 112  }
  0x13   :  { %160 = vmatpush.bf16.msra.mxu1 %v1008_v29  ;;  %v1527_v29 = vld [vmem:[%s1774_s1 + $0x10] sm:$0xff] }
  0x14   :  { %v59_v26 = vadd.f32 %v1248_v7, %v58_v19 }
  0x16   :  { %v1478_v35 = vsel %vm60_vm1, %v1248_v7, %v59_v26  ;;  %147 = vmatpush.bf16.msra.mxu0 %v996_v33  ;;  %v1534_v33 = vld [vmem:[%s1774_s1 + $0x18] sm:$0xff]  ;;  %s1365_s1 = smov 16  }
  0x17   :  { %161 = vmatpush.bf16.msra.mxu1 %v1000_v36 }
  0x7d   :  { %v51_v37 = vpop.xlane.xlu0 %50 }
  0x7e   :  { %v62_v38 = vmul.f32 %v1478_v35, %v51_v37 }
  0x80   :  { %v64_v39 = vadd.f32 1e-05, %v62_v38  ;;  %v1200_v38 = vld [vmem:[#allocation2 + $0x8] sm:$0xff] }
  0x82   :  { %1249 = vrsqrt.f32 %v64_v39  ;;  %vm72_vm3 = vweird.f32 %v64_v39 }
  0x85   :  { %v54_v40 = vpop.xlane.xlu0 %53 }
  0x86   :  { %v63_v41 = vmul.f32 %v1478_v35, %v54_v40 }
  0x88   :  { %v1250_v42 = vpop.eup %1249  ;;  %v65_v43 = vadd.f32 1e-05, %v63_v41 }
  0x89   :  { %v67_v44 = vmul.f32 %v1250_v42, %v64_v39  ;;  %vm73_vm2 = vweird.f32 %v1250_v42 }
  0x8a   :  { %1251 = vrsqrt.f32 %v65_v43  ;;  %vm74_vm5 = vmor %vm72_vm3, %vm73_vm2  ;;  %vm82_vm6 = vweird.f32 %v65_v43 }
  0x8b   :  { %v68_v45 = vmul.f32 %v1250_v42, %v67_v44 }
  0x8d   :  { %v69_v46 = vmul.f32 0.5, %v68_v45 }
  0x8f   :  { %v70_v48 = vsub.f32 1.5, %v69_v46 }
  0x90   :  { %v1252_v47 = vpop.eup %1251 }
  0x91   :  { %v77_v49 = vmul.f32 %v1252_v47, %v65_v43  ;;  %v71_v51 = vmul.f32 %v1250_v42, %v70_v48  ;;  %vm83_vm4 = vweird.f32 %v1252_v47 }
  0x92   :  { %vm84_vm7 = vmor %vm82_vm6, %vm83_vm4 }
  0x93   :  { %v78_v50 = vmul.f32 %v1252_v47, %v77_v49  ;;  %v75_v55 = vsel %vm74_vm5, %v1250_v42, %v71_v51 }
  0x94   :  { %v86_v57 = vmul.f32 %v75_v55, %v1417_v0 }
  0x95   :  { %v79_v52 = vmul.f32 0.5, %v78_v50 }
  0x97   :  { %v80_v53 = vsub.f32 1.5, %v79_v52 }
  0x99   :  { %v81_v54 = vmul.f32 %v1252_v47, %v80_v53 }
  0x9b   :  { %v85_v56 = vsel %vm84_vm7, %v1252_v47, %v81_v54 }
  0x9c   :  { %v87_v58 = vmul.f32 %v85_v56, %v1424_v2 }
  0x9e   :  { %v88_v59 = vpack.c.bf16 %v87_v58, %v86_v57 }
  0xa0   :  { %1025 = vmatmul.msk.bf16.vlgmr.msra.gmra.mxu0 %vm48_vm0, %v88_v59  ;;  %1026 = vmatmul.msk.bf16.vlgmr.msra.gmra.mxu1 %vm48_vm0, %v88_v59 }
 0x11d   :  { %v149_v60 = vpop.f32.mrf.mxu0  ;;  %v163_v62 = vpop.f32.mrf.mxu1 }
 0x11e   :  { %v172_v1 = vmul.f32 %v168_v61, %v149_v60  ;;  %v174_v3 = vmul.f32 %v170_v63, %v163_v62  ;;  %v1199_v63 = vld [vmem:[#allocation2] sm:$0xff] }
 0x120   :  { %v176_v6 = vadd.f32 %v174_v3, %v172_v1 }
 0x122   :  { %v178_v11 = vpack.c.bf16 %v176_v6, %v176_v6 }
 0x124   :  { %v194_v14 = vunpack.c.l.b16 %v178_v11 }
 0x125   :  { %v151_v7 = vpop.f32.mrf.mxu0  ;;  %v165_v8 = vpop.f32.mrf.mxu1 }
 0x126   :  { %v173_v9 = vmul.f32 %v169_v4, %v151_v7  ;;  %v175_v10 = vmul.f32 %v171_v5, %v165_v8 }
 0x128   :  { %v177_v12 = vadd.f32 %v175_v10, %v173_v9 }
 0x12a   :  { %v179_v13 = vpack.c.bf16 %v177_v12, %v177_v12 }
 0x12c   :  { %v195_v15 = vunpack.c.l.b16 %v179_v13 }
 0x12e   :  { %v1498_v16 = vpack.c.b16 %v195_v15, %v194_v14 }
 0x130   :  { %268 = vrot.lane.b32.xlu0 %v1498_v16, %s1361_s25  ;;  %199 = vrot.lane.b32.xlu1 %v1498_v16, %s1358_s29  ;;  %s1368_s25 = smov 8  }
 0x138   :  { %368 = vrot.lane.b32.xlu0 %v1498_v16, %s1362_s26  ;;  %197 = vrot.lane.b32.xlu1 %v1498_v16, %s1363_s2 }
 0x1a2   :  { %v269_v17 = vpop.permute.xlu0 %268  ;;  %v200_v18 = vpop.permute.xlu1 %199 }
 0x1a3   :  { %284 = vmatpush.bf16.msra.mxu3 %v269_v17  ;;  %v209_v19 = vsel %vm201_vm8, %v200_v18, 0 }
 0x1a4   :  { %218 = vmatpush.bf16.xpose.msra.mxu2 %v209_v19 }
 0x1a7   :  { %329 = vmatpush.bf16.msrb.mxu3 %v1200_v38 }
 0x1aa   :  { %v198_v20 = vpop.permute.xlu1 %197  ;;  %v369_v50 = vpop.permute.xlu0 %368 }
 0x1ab   :  { %1027 = vmatmul.msk.bf16.vlgmr.msra.gmra.mxu2 %vm201_vm8, %v1498_v16  ;;  %366 = vrot.lane.b32.xlu0 %v198_v20, %s1364_s27  ;;  %v377_v54 = vsel %vm201_vm8, %v369_v50, 0 }
 0x1ac   :  { %357 = vmatpush.bf16.msrb.mxu2 %v1199_v63 }
 0x1bb   :  { %1028 = vmatmul.msk.bf16.gmra.mxu2 %vm201_vm8, %v198_v20 }
 0x21d   :  { %v367_v1 = vpop.permute.xlu0 %366 }
 0x22e   :  { %v220_v22 = vpop.f32.mrf.mxu2 }
 0x22f   :  { %v221_v23 = vadd.f32 %v220_v22, %v1513_v21 }
 0x231   :  { %v230_v24 = vsel %vm201_vm8, %v221_v23, -inf }
 0x232   :  { %231 = vmax.xlane.f32.xlu2 %v230_v24 }
 0x236   :  { %v222_v26 = vpop.f32.mrf.mxu2 }
 0x237   :  { %v223_v27 = vadd.f32 %v222_v26, %v1520_v25 }
 0x239   :  { %v233_v28 = vsel %vm201_vm8, %v223_v27, -inf }
 0x23a   :  { %234 = vmax.xlane.f32.xlu2 %v233_v28 }
 0x23e   :  { %v225_v30 = vpop.f32.mrf.mxu2 }
 0x23f   :  { %v226_v31 = vadd.f32 %v225_v30, %v1527_v29 }
 0x241   :  { %v236_v32 = vsel %vm201_vm8, %v226_v31, -inf }
 0x242   :  { %237 = vmax.xlane.f32.xlu1 %v236_v32 }
 0x246   :  { %v227_v34 = vpop.f32.mrf.mxu2 }
 0x247   :  { %v228_v36 = vadd.f32 %v227_v34, %v1534_v33 }
 0x249   :  { %v239_v37 = vsel %vm201_vm8, %v228_v36, -inf }
 0x24a   :  { %240 = vmax.xlane.f32.xlu2 %v239_v37 }
 0x2a5   :  { %v232_v39 = vpop.xlane.xlu2 %231 }
 0x2a6   :  { %v242_v40 = vsub.f32 %v221_v23, %v232_v39 }
 0x2a8   :  { %v246_v41 = vmul.f32 1.442695, %v242_v40 }
 0x2aa   :  { %1253 = vpow2.f32 %v246_v41 }
 0x2ad   :  { %v235_v42 = vpop.xlane.xlu2 %234 }
 0x2ae   :  { %v243_v43 = vsub.f32 %v223_v27, %v235_v42 }
 0x2b0   :  { %v1254_v44 = vpop.eup %1253  ;;  %v248_v45 = vmul.f32 1.442695, %v243_v43 }
 0x2b1   :  { %v254_v46 = vsel %vm201_vm8, %v1254_v44, 0.0 }
 0x2b2   :  { %1255 = vpow2.f32 %v248_v45  ;;  %255 = vadd.xlane.f32.xlu0 %v254_v46 }
 0x2b5   :  { %v238_v47 = vpop.xlane.xlu1 %237 }
 0x2b6   :  { %v244_v48 = vsub.f32 %v226_v31, %v238_v47 }
 0x2b8   :  { %v1256_v49 = vpop.eup %1255  ;;  %v250_v51 = vmul.f32 1.442695, %v244_v48 }
 0x2b9   :  { %v257_v52 = vsel %vm201_vm8, %v1256_v49, 0.0  ;;  %v266_v53 = vpack.c.bf16 %v1256_v49, %v1254_v44 }
 0x2ba   :  { %1257 = vpow2.f32 %v250_v51  ;;  %258 = vadd.xlane.f32.xlu1 %v257_v52 }
 0x2bb   :  { %1029 = vmatmul.msk.bf16.vlgmr.msra.gmra.mxu3 %vm201_vm8, %v266_v53 }
 0x2bc   :  { %386 = vmatpush.bf16.xpose.msra.mxu3 %v377_v54 }
 0x2bd   :  { %v241_v55 = vpop.xlane.xlu2 %240 }
 0x2be   :  { %v245_v56 = vsub.f32 %v228_v36, %v241_v55 }
 0x2c0   :  { %v1258_v57 = vpop.eup %1257  ;;  %v252_v58 = vmul.f32 1.442695, %v245_v56 }
 0x2c1   :  { %v260_v59 = vsel %vm201_vm8, %v1258_v57, 0.0 }
 0x2c2   :  { %1259 = vpow2.f32 %v252_v58  ;;  %261 = vadd.xlane.f32.xlu2 %v260_v59 }
 0x2c8   :  { %v1260_v60 = vpop.eup %1259 }
 0x2c9   :  { %v263_v61 = vsel %vm201_vm8, %v1260_v60, 0.0  ;;  %v267_v62 = vpack.c.bf16 %v1260_v60, %v1258_v57 }
 0x2ca   :  { %264 = vadd.xlane.f32.xlu2 %v263_v61 }
 0x2cb   :  { %1030 = vmatmul.msk.bf16.gmra.mxu3 %vm201_vm8, %v267_v62 }
 0x2e2   :  { %364 = vrot.lane.b32.xlu2 %v1498_v16, %s1364_s27 }
 0x325   :  { %v256_v3 = vpop.xlane.xlu0 %255 }
 0x326   :  { %1261 = vrcp.f32 %v256_v3 }
 0x32c   :  { %v1262_v6 = vpop.eup %1261 }
 0x32d   :  { %v259_v4 = vpop.xlane.xlu1 %258 }
 0x32e   :  { %1263 = vrcp.f32 %v259_v4 }
 0x334   :  { %v1264_v9 = vpop.eup %1263 }
 0x335   :  { %v262_v7 = vpop.xlane.xlu2 %261 }
 0x336   :  { %1265 = vrcp.f32 %v262_v7 }
 0x33c   :  { %v1266_v20 = vpop.eup %1265 }
 0x33d   :  { %v265_v17 = vpop.xlane.xlu2 %264 }
 0x33e   :  { %v286_v5 = vpop.f32.mrf.mxu3  ;;  %1267 = vrcp.f32 %v265_v17 }
 0x33f   :  { %v300_v8 = vmul.f32 %v1262_v6, %v286_v5 }
 0x341   :  { %v304_v11 = vpack.c.bf16 %v300_v8, %v300_v8  ;;  %v1201_v8 = vld [vmem:[#allocation2 + $0x10] sm:$0xff] }
 0x342   :  { %497 = vmatpush.bf16.msrb.mxu0 %v1201_v8 }
 0x343   :  { %v338_v14 = vunpack.c.l.b16 %v304_v11 }
 0x344   :  { %v1268_v23 = vpop.eup %1267 }
 0x345   :  { %v365_v34 = vpop.permute.xlu2 %364 }
 0x346   :  { %v288_v10 = vpop.f32.mrf.mxu3 }
 0x347   :  { %v301_v12 = vmul.f32 %v1264_v9, %v288_v10 }
 0x349   :  { %v305_v13 = vpack.c.bf16 %v301_v12, %v301_v12 }
 0x34b   :  { %v339_v15 = vunpack.c.l.b16 %v305_v13 }
 0x34d   :  { %v340_v18 = vpack.c.b16 %v339_v15, %v338_v14 }
 0x34e   :  { %v291_v19 = vpop.f32.mrf.mxu3 }
 0x34f   :  { %1040 = vmatmul.msk.bf16.vlgmr.msrb.gmra.mxu2 %vm201_vm8, %v340_v18  ;;  %v302_v22 = vmul.f32 %v1266_v20, %v291_v19 }
 0x351   :  { %v306_v26 = vpack.c.bf16 %v302_v22, %v302_v22 }
 0x353   :  { %v310_v30 = vunpack.c.l.b16 %v306_v26  ;;  %v1202_v26 = vld [vmem:[#allocation2 + $0x18] sm:$0xff] }
 0x354   :  { %527 = vmatpush.bf16.msrb.mxu1 %v1202_v26  ;;  %v1083_v26 = vld [vmem:[%s1778_s5 + $0x38] sm:$0xf0] }
 0x356   :  { %v293_v24 = vpop.f32.mrf.mxu3 }
 0x357   :  { %v303_v27 = vmul.f32 %v1268_v23, %v293_v24 }
 0x359   :  { %v307_v28 = vpack.c.bf16 %v303_v27, %v303_v27 }
 0x35b   :  { %v311_v31 = vunpack.c.l.b16 %v307_v28 }
 0x35d   :  { %v312_v32 = vpack.c.b16 %v311_v31, %v310_v30 }
 0x35f   :  { %1035 = vmatmul.msk.bf16.vlgmr.msrb.gmra.mxu3 %vm201_vm8, %v312_v32 }
 0x36f   :  { %1041 = vmatmul.msk.bf16.vlgmr.msra.gmra.mxu3 %vm201_vm8, %v365_v34 }
 0x37f   :  { %1042 = vmatmul.msk.bf16.gmra.mxu3 %vm201_vm8, %v367_v1 }
 0x3d2   :  { %v359_v36 = vpop.f32.mrf.mxu2 }
 0x3da   :  { %v361_v9 = vpop.f32.mrf.mxu2 }
 0x3e2   :  { %v331_v37 = vpop.f32.mrf.mxu3 }
 0x3e3   :  { %v1551_v38 = vadd.f32 %v359_v36, %v331_v37 }
 0x3ea   :  { %v1553_v39 = vpop.f32.mrf.mxu3 }
 0x3f2   :  { %v388_v40 = vpop.f32.mrf.mxu3 }
 0x3f3   :  { %v389_v41 = vadd.f32 %v388_v40, %v1513_v21 }
 0x3f5   :  { %v398_v42 = vsel %vm201_vm8, %v389_v41, -inf }
 0x3f6   :  { %399 = vmax.xlane.f32.xlu2 %v398_v42 }
 0x3fa   :  { %v390_v43 = vpop.f32.mrf.mxu3 }
 0x3fb   :  { %v391_v44 = vadd.f32 %v390_v43, %v1520_v25 }
 0x3fd   :  { %v401_v45 = vsel %vm201_vm8, %v391_v44, -inf }
 0x3fe   :  { %402 = vmax.xlane.f32.xlu1 %v401_v45 }
 0x402   :  { %v393_v46 = vpop.f32.mrf.mxu3 }
 0x403   :  { %v394_v47 = vadd.f32 %v393_v46, %v1527_v29 }
 0x405   :  { %v404_v48 = vsel %vm201_vm8, %v394_v47, -inf }
 0x406   :  { %405 = vmax.xlane.f32.xlu0 %v404_v48 }
 0x40a   :  { %v395_v49 = vpop.f32.mrf.mxu3 }
 0x40b   :  { %v396_v21 = vadd.f32 %v395_v49, %v1534_v33 }
 0x40d   :  { %v407_v50 = vsel %vm201_vm8, %v396_v21, -inf }
 0x417   :  { %436 = vrot.lane.b32.xlu1 %v1498_v16, %s1365_s1 }
 0x441   :  { %408 = vmax.xlane.f32.xlu1 %v407_v50  ;;  %v362_v50 = vadd.f32 %v361_v9, %v1553_v39  ;;  %v1105_v39 = vld [vmem:[%s1778_s5 + $0x60] sm:$0xf] }
 0x469   :  { %v400_v51 = vpop.xlane.xlu2 %399 }
 0x46a   :  { %v410_v25 = vsub.f32 %v389_v41, %v400_v51 }
 0x46c   :  { %v414_v52 = vmul.f32 1.442695, %v410_v25 }
 0x46e   :  { %1269 = vpow2.f32 %v414_v52 }
 0x471   :  { %v403_v53 = vpop.xlane.xlu1 %402 }
 0x472   :  { %v411_v54 = vsub.f32 %v391_v44, %v403_v53 }
 0x474   :  { %v1270_v55 = vpop.eup %1269  ;;  %v416_v29 = vmul.f32 1.442695, %v411_v54 }
 0x475   :  { %v422_v56 = vsel %vm201_vm8, %v1270_v55, 0.0 }
 0x476   :  { %1271 = vpow2.f32 %v416_v29  ;;  %423 = vadd.xlane.f32.xlu0 %v422_v56  ;;  %v1217_v29 = vld [vmem:[%s1778_s5 + $0x6c] sm:$0xf0]  ;;  %v1215_v56 = vld [vmem:[%s1778_s5 + $0x64] sm:$0xf] }
 0x479   :  { %v406_v57 = vpop.xlane.xlu0 %405 }
 0x47a   :  { %v412_v16 = vsub.f32 %v394_v47, %v406_v57  ;;  %v1107_v57 = vld [vmem:[%s1778_s5 + $0x70] sm:$0xf0] }
 0x47c   :  { %v1272_v58 = vpop.eup %1271  ;;  %v418_v59 = vmul.f32 1.442695, %v412_v16  ;;  %v1113_v16 = vld [vmem:[%s1778_s5 + $0x68] sm:$0xf] }
 0x47d   :  { %v425_v33 = vsel %vm201_vm8, %v1272_v58, 0.0  ;;  %v434_v63 = vpack.c.bf16 %v1272_v58, %v1270_v55  ;;  %v1218_v58 = vld [vmem:[%s1778_s5 + $0x74] sm:$0xf0] }
 0x47e   :  { %1273 = vpow2.f32 %v418_v59  ;;  %426 = vadd.xlane.f32.xlu2 %v425_v33  ;;  %v1110_v59 = vor.u32 %v1215_v56, %v1107_v57  ;;  %v1114_v33 = vor.u32 %v1218_v58, %v1113_v16 }
 0x480   :  { %690 = vmatpush.bf16.msra.mxu1 %v1110_v59  ;;  %704 = vmatpush.bf16.msrb.mxu3 %v1114_v33 }
 0x484   :  { %v1274_v60 = vpop.eup %1273 }
 0x485   :  { %v428_v61 = vsel %vm201_vm8, %v1274_v60, 0.0 }
 0x486   :  { %429 = vadd.xlane.f32.xlu0 %v428_v61  ;;  %v1115_v61 = vld [vmem:[%s1778_s5 + $0x78] sm:$0xf0] }
 0x489   :  { %v437_v62 = vpop.permute.xlu1 %436 }
 0x48a   :  { %452 = vmatpush.bf16.msra.mxu2 %v437_v62 }
 0x48d   :  { %1043 = vmatmul.msk.bf16.vlgmr.msra.gmra.mxu2 %vm201_vm8, %v434_v63  ;;  %v1089_v63 = vld [vmem:[%s1778_s5 + $0x40] sm:$0xf] }
 0x4b4   :  { %v409_v1 = vpop.xlane.xlu1 %408 }
 0x4b5   :  { %v413_v3 = vsub.f32 %v396_v21, %v409_v1  ;;  %v1213_v1 = vld [vmem:[%s1778_s5 + $0x4c] sm:$0xf0] }
 0x4b7   :  { %v420_v4 = vmul.f32 1.442695, %v413_v3  ;;  %v1211_v3 = vld [vmem:[%s1778_s5 + $0x44] sm:$0xf] }
 0x4b9   :  { %1275 = vpow2.f32 %v420_v4  ;;  %v1090_v4 = vor.u32 %v1213_v1, %v1089_v63  ;;  %v1233_v63 = vld [vmem:[%s1779_s6 + $0x70] sm:$0xff]  ;;  %v1224_v1 = vld [vmem:[%s1779_s6 + $0x28] sm:$0xff] }
 0x4bf   :  { %v1276_v5 = vpop.eup %1275 }
 0x4c0   :  { %v431_v6 = vsel %vm201_vm8, %v1276_v5, 0.0  ;;  %v435_v7 = vpack.c.bf16 %v1276_v5, %v1274_v60  ;;  %v1216_v60 = vld [vmem:[%s1778_s5 + $0x6c] sm:$0xf]  ;;  %v1091_v5 = vld [vmem:[%s1778_s5 + $0x50] sm:$0xf0] }
 0x4c1   :  { %432 = vadd.xlane.f32.xlu2 %v431_v6  ;;  %v1118_v62 = vor.u32 %v1216_v60, %v1115_v61  ;;  %v1097_v6 = vld [vmem:[%s1778_s5 + $0x48] sm:$0xf]  ;;  %v1094_v8 = vor.u32 %v1211_v3, %v1091_v5  ;;  %v1226_v60 = vld [vmem:[%s1779_s6 + $0x38] sm:$0xff]  ;;  %v1231_v5 = vld [vmem:[%s1779_s6 + $0x60] sm:$0xff] }
 0x4c2   :  { %1044 = vmatmul.msk.bf16.gmra.mxu2 %vm201_vm8, %v435_v7  ;;  %v1214_v7 = vld [vmem:[%s1778_s5 + $0x54] sm:$0xf0]  ;;  %v1232_v3 = vld [vmem:[%s1779_s6 + $0x68] sm:$0xff] }
 0x4c3   :  { %718 = vmatpush.bf16.msrb.mxu2 %v1118_v62  ;;  %v1098_v9 = vor.u32 %v1214_v7, %v1097_v6  ;;  %691 = vmatpush.bf16.msra.mxu1 %v1094_v8  ;;  %v1234_v61 = vld [vmem:[%s1779_s6 + $0x78] sm:$0xff]  ;;  %v1225_v62 = vld [vmem:[%s1779_s6 + $0x30] sm:$0xff] }
 0x4c4   :  { %v1222_v6 = vld [vmem:[%s1779_s6 + $0x18] sm:$0xff] }
 0x4c5   :  { %705 = vmatpush.bf16.msrb.mxu3 %v1098_v9  ;;  %v1230_v7 = vld [vmem:[%s1779_s6 + $0x58] sm:$0xff] }
 0x4e9   :  { %v424_v10 = vpop.xlane.xlu0 %423 }
 0x4ea   :  { %1277 = vrcp.f32 %v424_v10  ;;  %v1212_v10 = vld [vmem:[%s1778_s5 + $0x4c] sm:$0xf] }
 0x4f0   :  { %v1278_v13 = vpop.eup %1277 }
 0x4f1   :  { %v427_v11 = vpop.xlane.xlu2 %426 }
 0x4f2   :  { %1279 = vrcp.f32 %v427_v11  ;;  %v1099_v11 = vld [vmem:[%s1778_s5 + $0x58] sm:$0xf0] }
 0x4f8   :  { %v1280_v15 = vpop.eup %1279 }
 0x4f9   :  { %v430_v27 = vpop.xlane.xlu0 %429 }
 0x4fa   :  { %1281 = vrcp.f32 %v430_v27 }
 0x500   :  { %v1282_v31 = vpop.eup %1281 }
 0x510   :  { %v454_v12 = vpop.f32.mrf.mxu2 }
 0x511   :  { %v468_v14 = vmul.f32 %v1278_v13, %v454_v12  ;;  %v1102_v12 = vor.u32 %v1212_v10, %v1099_v11  ;;  %v1073_v13 = vld [vmem:[%s1778_s5 + $0x20] sm:$0xf] }
 0x513   :  { %v472_v18 = vpack.c.bf16 %v468_v14, %v468_v14  ;;  %v1209_v14 = vld [vmem:[%s1778_s5 + $0x2c] sm:$0xf0]  ;;  %719 = vmatpush.bf16.msrb.mxu2 %v1102_v12 }
 0x514   :  { %v1221_v12 = vld [vmem:[%s1779_s6 + $0x10] sm:$0xff] }
 0x515   :  { %v478_v22 = vunpack.c.l.b16 %v472_v18  ;;  %v1075_v18 = vld [vmem:[%s1778_s5 + $0x30] sm:$0xf0] }
 0x518   :  { %v456_v17 = vpop.f32.mrf.mxu2 }
 0x519   :  { %v469_v19 = vmul.f32 %v1280_v15, %v456_v17  ;;  %v1207_v15 = vld [vmem:[%s1778_s5 + $0x24] sm:$0xf]  ;;  %v1074_v17 = vor.u32 %v1209_v14, %v1073_v13  ;;  %v1229_v13 = vld [vmem:[%s1779_s6 + $0x50] sm:$0xff]  ;;  %v1220_v14 = vld [vmem:[%s1779_s6 + $0x8] sm:$0xff] }
 0x51b   :  { %v473_v20 = vpack.c.bf16 %v469_v19, %v469_v19  ;;  %v1081_v19 = vld [vmem:[%s1778_s5 + $0x28] sm:$0xf] }
 0x51d   :  { %v479_v23 = vunpack.c.l.b16 %v473_v20  ;;  %v1210_v20 = vld [vmem:[%s1778_s5 + $0x34] sm:$0xf0] }
 0x51f   :  { %v480_v24 = vpack.c.b16 %v479_v23, %v478_v22  ;;  %v1078_v22 = vor.u32 %v1207_v15, %v1075_v18  ;;  %v1082_v23 = vor.u32 %v1210_v20, %v1081_v19  ;;  %v1228_v15 = vld [vmem:[%s1779_s6 + $0x48] sm:$0xff] }
 0x521   :  { %1049 = vmatmul.msk.bf16.vlgmr.msrb.gmra.mxu0 %vm201_vm8, %v480_v24  ;;  %v1208_v24 = vld [vmem:[%s1778_s5 + $0x2c] sm:$0xf]  ;;  %692 = vmatpush.bf16.msra.mxu1 %v1078_v22 }
 0x522   :  { %v1086_v27 = vor.u32 %v1208_v24, %v1083_v26  ;;  %706 = vmatpush.bf16.msrb.mxu3 %v1082_v23  ;;  %v1219_v26 = vld [vmem:[%s1779_s6] sm:$0xff] }
 0x524   :  { %720 = vmatpush.bf16.msrb.mxu2 %v1086_v27  ;;  %v1227_v27 = vld [vmem:[%s1779_s6 + $0x40] sm:$0xff] }
 0x534   :  { %v433_v28 = vpop.xlane.xlu2 %432 }
 0x535   :  { %1283 = vrcp.f32 %v433_v28  ;;  %v1057_v28 = vld [vmem:[%s1778_s5] sm:$0xf] }
 0x53b   :  { %v1284_v34 = vpop.eup %1283 }
 0x545   :  { %v459_v30 = vpop.f32.mrf.mxu2 }
 0x546   :  { %v470_v32 = vmul.f32 %v1282_v31, %v459_v30  ;;  %v1205_v30 = vld [vmem:[%s1778_s5 + $0xc] sm:$0xf0]  ;;  %v1203_v31 = vld [vmem:[%s1778_s5 + $0x4] sm:$0xf] }
 0x548   :  { %v474_v37 = vpack.c.bf16 %v470_v32, %v470_v32  ;;  %v1058_v32 = vor.u32 %v1205_v30, %v1057_v28 }
 0x54a   :  { %v508_v42 = vunpack.c.l.b16 %v474_v37  ;;  %v1206_v37 = vld [vmem:[%s1778_s5 + $0x14] sm:$0xf0] }
 0x54d   :  { %v461_v36 = vpop.f32.mrf.mxu2 }
 0x54e   :  { %v471_v40 = vmul.f32 %v1284_v34, %v461_v36  ;;  %v1059_v34 = vld [vmem:[%s1778_s5 + $0x10] sm:$0xf0]  ;;  %v1065_v36 = vld [vmem:[%s1778_s5 + $0x8] sm:$0xf] }
 0x550   :  { %v475_v41 = vpack.c.bf16 %v471_v40, %v471_v40 }
 0x552   :  { %v509_v43 = vunpack.c.l.b16 %v475_v41  ;;  %v1062_v41 = vor.u32 %v1203_v31, %v1059_v34 }
 0x554   :  { %v510_v44 = vpack.c.b16 %v509_v43, %v508_v42  ;;  %v1066_v42 = vor.u32 %v1206_v37, %v1065_v36  ;;  %v1204_v43 = vld [vmem:[%s1778_s5 + $0xc] sm:$0xf]  ;;  %693 = vmatpush.bf16.msra.mxu1 %v1062_v41 }
 0x556   :  { %1054 = vmatmul.msk.bf16.vlgmr.msrb.gmra.mxu1 %vm201_vm8, %v510_v44  ;;  %v1067_v44 = vld [vmem:[%s1778_s5 + $0x18] sm:$0xf0]  ;;  %707 = vmatpush.bf16.msrb.mxu3 %v1066_v42 }
 0x558   :  { %956 = vmatpush.bf16.msrb.mxu1 %v1234_v61 }
 0x55c   :  { %957 = vmatpush.bf16.msrb.mxu1 %v1233_v63 }
 0x560   :  { %958 = vmatpush.bf16.msrb.mxu1 %v1232_v3 }
 0x564   :  { %959 = vmatpush.bf16.msrb.mxu1 %v1231_v5 }
 0x568   :  { %960 = vmatpush.bf16.msrb.mxu1 %v1230_v7 }
 0x56c   :  { %961 = vmatpush.bf16.msrb.mxu1 %v1229_v13 }
 0x570   :  { %962 = vmatpush.bf16.msrb.mxu1 %v1228_v15 }
 0x574   :  { %963 = vmatpush.bf16.msrb.mxu1 %v1227_v27 }
 0x59e   :  { %v499_v45 = vpop.f32.mrf.mxu0 }
 0x59f   :  { %v504_v46 = vadd.f32 %v499_v45, %v1551_v38 }
 0x5a6   :  { %v501_v21 = vpop.f32.mrf.mxu0 }
 0x5a7   :  { %v505_v25 = vadd.f32 %v501_v21, %v362_v50 }
 0x5d3   :  { %v529_v47 = vpop.f32.mrf.mxu1 }
 0x5d4   :  { %v534_v48 = vadd.f32 %v529_v47, %v504_v46  ;;  %v1070_v46 = vor.u32 %v1204_v43, %v1067_v44 }
 0x5d6   :  { %v1574_v49 = vadd.f32 %v534_v48, %v1417_v0  ;;  %721 = vmatpush.bf16.msrb.mxu2 %v1070_v46 }
 0x5d8   :  { %v538_v51 = vmul.f32 %v1574_v49, %v1574_v49 }
 0x5da   :  { %v540_v52 = vsel %vm48_vm0, %v538_v51, 0.0 }
 0x5db   :  { %541 = vadd.xlane.f32.xlu0 %v540_v52  ;;  %v531_v53 = vpop.f32.mrf.mxu1 }
 0x5dc   :  { %v535_v54 = vadd.f32 %v531_v53, %v505_v25 }
 0x5de   :  { %v1581_v55 = vadd.f32 %v535_v54, %v1424_v2  ;;  %v1106_v2 = vor.u32 %v1217_v29, %v1105_v39 }
 0x5e0   :  { %v539_v38 = vmul.f32 %v1581_v55, %v1581_v55  ;;  %676 = vmatpush.bf16.msra.mxu0 %v1106_v2 }
 0x5e2   :  { %v543_v0 = vsel %vm48_vm0, %v539_v38, 0.0 }
 0x5e3   :  { %544 = vadd.xlane.f32.xlu2 %v543_v0 }
 0x5e4   :  { %677 = vmatpush.bf16.msra.mxu0 %v1090_v4  ;;  %v1223_v4 = vld [vmem:[%s1779_s6 + $0x20] sm:$0xff]  ;;  %s1366_s6 = smov [#allocation5]  }
 0x5e5   :  { %s978_s20 = sshll.u32 %s1366_s6, 4  ;;  %s979_s20 = int_to_ptr.vmem [resolvable:$true] %s978_s20 }
 0x5e8   :  { %678 = vmatpush.bf16.msra.mxu0 %v1074_v17 }
 0x5ec   :  { %679 = vmatpush.bf16.msra.mxu0 %v1058_v32 }
 0x5f0   :  { %942 = vmatpush.bf16.msrb.mxu0 %v1226_v60 }
 0x5f4   :  { %943 = vmatpush.bf16.msrb.mxu0 %v1225_v62 }
 0x5f8   :  { %944 = vmatpush.bf16.msrb.mxu0 %v1224_v1 }
 0x5fc   :  { %945 = vmatpush.bf16.msrb.mxu0 %v1223_v4 }
 0x600   :  { %946 = vmatpush.bf16.msrb.mxu0 %v1222_v6 }
 0x604   :  { %947 = vmatpush.bf16.msrb.mxu0 %v1221_v12 }
 0x608   :  { %948 = vmatpush.bf16.msrb.mxu0 %v1220_v14 }
 0x60c   :  { %949 = vmatpush.bf16.msrb.mxu0 %v1219_v26 }
 0x64e   :  { %v542_v40 = vpop.xlane.xlu0 %541 }
 0x64f   :  { %v546_v45 = vmul.f32 %v542_v40, %v1478_v35 }
 0x651   :  { %v548_v47 = vadd.f32 1e-05, %v546_v45 }
 0x653   :  { %1285 = vrsqrt.f32 %v548_v47  ;;  %vm556_vm10 = vweird.f32 %v548_v47 }
 0x656   :  { %v545_v48 = vpop.xlane.xlu2 %544 }
 0x657   :  { %v547_v21 = vmul.f32 %v545_v48, %v1478_v35 }
 0x659   :  { %v1286_v50 = vpop.eup %1285  ;;  %v549_v51 = vadd.f32 1e-05, %v547_v21 }
 0x65a   :  { %v551_v25 = vmul.f32 %v1286_v50, %v548_v47  ;;  %vm557_vm9 = vweird.f32 %v1286_v50 }
 0x65b   :  { %1287 = vrsqrt.f32 %v549_v51  ;;  %vm558_vm12 = vmor %vm556_vm10, %vm557_vm9  ;;  %vm566_vm13 = vweird.f32 %v549_v51 }
 0x65c   :  { %v552_v52 = vmul.f32 %v1286_v50, %v551_v25 }
 0x65e   :  { %v553_v53 = vmul.f32 0.5, %v552_v52 }
 0x660   :  { %v554_v38 = vsub.f32 1.5, %v553_v53 }
 0x661   :  { %v1288_v54 = vpop.eup %1287 }
 0x662   :  { %v561_v0 = vmul.f32 %v1288_v54, %v549_v51  ;;  %v555_v29 = vmul.f32 %v1286_v50, %v554_v38  ;;  %vm567_vm11 = vweird.f32 %v1288_v54 }
 0x663   :  { %vm568_vm14 = vmor %vm566_vm13, %vm567_vm11 }
 0x664   :  { %v562_v39 = vmul.f32 %v1288_v54, %v561_v0  ;;  %v559_v57 = vsel %vm558_vm12, %v1286_v50, %v555_v29 }
 0x665   :  { %v570_v58 = vmul.f32 %v559_v57, %v1574_v49 }
 0x666   :  { %v563_v56 = vmul.f32 0.5, %v562_v39 }
 0x668   :  { %v564_v2 = vsub.f32 1.5, %v563_v56 }
 0x66a   :  { %v565_v16 = vmul.f32 %v1288_v54, %v564_v2 }
 0x66c   :  { %v569_v35 = vsel %vm568_vm14, %v1288_v54, %v565_v16 }
 0x66d   :  { %v571_v59 = vmul.f32 %v569_v35, %v1581_v55 }
 0x66f   :  { %v572_v33 = vpack.c.bf16 %v571_v59, %v570_v58 }
 0x671   :  { %1119 = vmatmul.msk.bf16.vlgmr.msra.gmra.mxu0 %vm48_vm0, %v572_v33  ;;  %1120 = vmatmul.msk.bf16.vlgmr.msra.gmra.mxu1 %vm48_vm0, %v572_v33 }
 0x672   :  { %1121 = vmatmul.msk.bf16.vlgmr.msrb.gmra.mxu3 %vm48_vm0, %v572_v33  ;;  %1122 = vmatmul.msk.bf16.vlgmr.msrb.gmra.mxu2 %vm48_vm0, %v572_v33 }
 0x6ee   :  { %v1720_v8 = vpop.f32.mrf.mxu0  ;;  %v1722_v9 = vpop.f32.mrf.mxu1 }
 0x6ef   :  { %v1123_v10 = vmul.f32 -1.442695, %v1720_v8  ;;  %v1124_v11 = vmul.f32 -1.442695, %v1722_v9 }
 0x6f1   :  { %1289 = vpow2.f32 %v1123_v10 }
 0x6f2   :  { %1291 = vpow2.f32 %v1124_v11 }
 0x6f5   :  { %v709_v53 = vpop.f32.mrf.mxu3  ;;  %v723_v16 = vpop.f32.mrf.mxu2 }
 0x6f6   :  { %v1738_v17 = vpop.f32.mrf.mxu0  ;;  %v1740_v18 = vpop.f32.mrf.mxu1 }
 0x6f7   :  { %v1290_v19 = vpop.eup %1289  ;;  %v1125_v20 = vmul.f32 -1.442695, %v1738_v17  ;;  %v1126_v24 = vmul.f32 -1.442695, %v1740_v18 }
 0x6f8   :  { %v1292_v22 = vpop.eup %1291  ;;  %v740_v23 = vadd.f32 1.0, %v1290_v19 }
 0x6f9   :  { %v741_v28 = vadd.f32 1.0, %v1292_v22  ;;  %1293 = vpow2.f32 %v1125_v20 }
 0x6fa   :  { %1295 = vrcp.f32 %v740_v23  ;;  %v755_v48 = vand.u32 2147483648, %v740_v23  ;;  %vm749_vm1 = vweird.f32 %v740_v23  ;;  %v753_v21 = vand.u32 2147483647, %v740_v23 }
 0x6fb   :  { %1297 = vrcp.f32 %v741_v28  ;;  %v768_v52 = vand.u32 2147483647, %v741_v28  ;;  %v770_v0 = vand.u32 2147483648, %v741_v28  ;;  %vm764_vm4 = vweird.f32 %v741_v28 }
 0x6fc   :  { %1299 = vpow2.f32 %v1126_v24  ;;  %v756_v29 = vor.u32 1.1754944e-38, %v755_v48  ;;  %vm754_vm5 = vcmp.eq.f32.partialorder %v753_v21, 8.507059e+37 }
 0x6fd   :  { %vm769_vm8 = vcmp.eq.f32.partialorder %v768_v52, 8.507059e+37  ;;  %v771_v61 = vor.u32 1.1754944e-38, %v770_v0  ;;  %v711_v19 = vpop.f32.mrf.mxu3  ;;  %v725_v26 = vpop.f32.mrf.mxu2 }
 0x6ff   :  { %v1294_v30 = vpop.eup %1293 }
 0x700   :  { %v1296_v31 = vpop.eup %1295  ;;  %v742_v32 = vadd.f32 1.0, %v1294_v30 }
 0x701   :  { %v1298_v34 = vpop.eup %1297  ;;  %v745_v36 = vmul.f32 %v1296_v31, %v740_v23  ;;  %vm750_vm15 = vweird.f32 %v1296_v31 }
 0x702   :  { %v1300_v37 = vpop.eup %1299  ;;  %v760_v40 = vmul.f32 %v1298_v34, %v741_v28  ;;  %1301 = vrcp.f32 %v742_v32  ;;  %vm1750_vm2 = vmor %vm749_vm1, %vm750_vm15  ;;  %vm765_vm3 = vweird.f32 %v1298_v34  ;;  %v785_v56 = vand.u32 2147483648, %v742_v32 }
 0x703   :  { %v746_v41 = vsub.f32 1.0, %v745_v36  ;;  %v743_v42 = vadd.f32 1.0, %v1300_v37  ;;  %vm1756_vm6 = vmor %vm764_vm4, %vm765_vm3  ;;  %v783_v58 = vand.u32 2147483647, %v742_v32  ;;  %vm779_vm9 = vweird.f32 %v742_v32 }
 0x704   :  { %v761_v43 = vsub.f32 1.0, %v760_v40  ;;  %v786_v1 = vor.u32 1.1754944e-38, %v785_v56 }
 0x705   :  { %v747_v44 = vmul.f32 %v1296_v31, %v746_v41  ;;  %1303 = vrcp.f32 %v743_v42  ;;  %v800_v63 = vand.u32 2147483648, %v743_v42  ;;  %v798_v4 = vand.u32 2147483647, %v743_v42 }
 0x706   :  { %v762_v45 = vmul.f32 %v1298_v34, %v761_v43  ;;  %vm784_vm12 = vcmp.eq.f32.partialorder %v783_v58, 8.507059e+37  ;;  %vm794_vm13 = vweird.f32 %v743_v42 }
 0x707   :  { %v748_v46 = vadd.f32 %v1296_v31, %v747_v44  ;;  %v801_v13 = vor.u32 1.1754944e-38, %v800_v63  ;;  %vm799_vm15 = vcmp.eq.f32.partialorder %v798_v4, 8.507059e+37 }
 0x708   :  { %v1302_v47 = vpop.eup %1301  ;;  %v763_v25 = vadd.f32 %v1298_v34, %v762_v45 }
 0x709   :  { %v775_v50 = vmul.f32 %v1302_v47, %v742_v32  ;;  %v752_v38 = vsel %vm1750_vm2, %v1296_v31, %v748_v46  ;;  %vm780_vm7 = vweird.f32 %v1302_v47 }
 0x70a   :  { %v757_v59 = vsel %vm754_vm5, %v756_v29, %v752_v38  ;;  %v767_v33 = vsel %vm1756_vm6, %v1298_v34, %v763_v25  ;;  %vm781_vm10 = vmor %vm779_vm9, %vm780_vm7 }
 0x70b   :  { %v1304_v54 = vpop.eup %1303  ;;  %v776_v39 = vsub.f32 1.0, %v775_v50  ;;  %v804_v5 = vmul.f32 %v757_v59, %v1720_v8  ;;  %v772_v6 = vsel %vm769_vm8, %v771_v61, %v767_v33 }
 0x70c   :  { %v790_v2 = vmul.f32 %v1304_v54, %v743_v42  ;;  %vm795_vm11 = vweird.f32 %v1304_v54  ;;  %v805_v14 = vmul.f32 %v772_v6, %v1722_v9 }
 0x70d   :  { %v777_v35 = vmul.f32 %v1302_v47, %v776_v39  ;;  %vm796_vm14 = vmor %vm794_vm13, %vm795_vm11  ;;  %v808_v20 = vmul.f32 %v804_v5, %v709_v53 }
 0x70e   :  { %v791_v60 = vsub.f32 1.0, %v790_v2  ;;  %v809_v27 = vmul.f32 %v805_v14, %v723_v16 }
 0x70f   :  { %v778_v62 = vadd.f32 %v1302_v47, %v777_v35 }
 0x710   :  { %v792_v3 = vmul.f32 %v1304_v54, %v791_v60 }
 0x711   :  { %v782_v7 = vsel %vm781_vm10, %v1302_v47, %v778_v62 }
 0x712   :  { %v787_v10 = vsel %vm784_vm12, %v786_v1, %v782_v7  ;;  %v793_v11 = vadd.f32 %v1304_v54, %v792_v3 }
 0x713   :  { %v806_v12 = vmul.f32 %v787_v10, %v1738_v17 }
 0x714   :  { %v797_v15 = vsel %vm796_vm14, %v1304_v54, %v793_v11 }
 0x715   :  { %v802_v22 = vsel %vm799_vm15, %v801_v13, %v797_v15  ;;  %v810_v23 = vmul.f32 %v806_v12, %v711_v19 }
 0x716   :  { %v807_v8 = vmul.f32 %v802_v22, %v1740_v18 }
 0x717   :  { %v812_v24 = vpack.c.bf16 %v810_v23, %v808_v20 }
 0x718   :  { %v811_v28 = vmul.f32 %v807_v8, %v725_v26 }
 0x719   :  { %950 = vmatmul.bf16.vlgmr.msrb.gmra.mxu0 %v812_v24 }
 0x71a   :  { %v813_v30 = vpack.c.bf16 %v811_v28, %v809_v27 }
 0x71c   :  { %964 = vmatmul.bf16.vlgmr.msrb.gmra.mxu1 %v813_v30 }
 0x796   :  { %v951_v17 = vpop.f32.mrf.mxu0 }
 0x799   :  { %v965_v31 = vpop.f32.mrf.mxu1 }
 0x79a   :  { %v966_v32 = vadd.f32 %v965_v31, %v951_v17 }
 0x79c   :  { %v970_v9 = vadd.f32 %v966_v32, %v1574_v49 }
 0x79e   :  { %972 = vst.msk [vmem:[#allocation5] sm:$0xff] %vm48_vm0, %v970_v9  ;;  %v953_v34 = vpop.f32.mrf.mxu0 }
 0x7a1   :  { %v967_v18 = vpop.f32.mrf.mxu1 }
 0x7a2   :  { %v968_v36 = vadd.f32 %v967_v18, %v953_v34 }
 0x7a4   :  { %v971_v37 = vadd.f32 %v968_v36, %v1581_v55 }
 0x7a6   :  { %973 = vst.msk [vmem:[#allocation5 + $0x8] sm:$0xff] %vm48_vm0, %v971_v37 }
 0x7a7   :  { %986 = dma.vmem_to_hbm [thread:$0]  %s979_s20, 256, %s981_s23, [#allocation4], %s1367_s24, %s1367_s24, %s1368_s25  }
 0x7a8   :  { %1355 = dma.done.wait [#allocation4], 256  }
 0x7a9   :  { %1356 = vsyncadd [#allocation4], 4294967040 }
 0x7aa   :  { %991 = vsyncpa [#allocation3], 1 }
 0x7ab   :  { %992 = vsyncpa [#allocation4], 1 }

</bundles_post_ra>
